<compile_context>
chip_gen: v5e
topology: v5e:2x2
jax: 0.10.0
libtpu: 0.0.40
codegen_flags: <defaults>
</compile_context>

<pallas_src>
import functools

import jax
import jax.numpy as jnp
from jax.experimental import pallas as pl
from jax.experimental.pallas import tpu as pltpu

N_HIDDEN = 32     # nodes per hidden layer (fixed by the module)
N_OUTPUT = 24     # output nodes (fixed by the module)
SUBLANE = 8       # batch-tile granularity (batch lives on sublanes now)


def _cdiv(a, b):
    return -(-a // b)


def _round_up(x, m):
    return _cdiv(x, m) * m


def _block_diag_mask(block_rows, block_cols, n_blocks):
    """jnp equivalent of torch.block_diag(ones(block_rows, block_cols), ... n_blocks times)."""
    m = jnp.zeros((block_rows * n_blocks, block_cols * n_blocks), jnp.float32)
    for i in range(n_blocks):
        m = m.at[i * block_rows:(i + 1) * block_rows,
                 i * block_cols:(i + 1) * block_cols].set(1.0)
    return m


# ----------------------------------- kernel -----------------------------------

def _bd_kernel(n_rep, has_bias, *refs):
    """Batch-major layout: batch rows on sublanes, features on lanes.

    refs (in order):
      x_ref     : (tb, n_input)
      w_in_ref  : (n_input, 32)
      [b_in_ref : (1, 32)]                       only if has_bias
      [w_hid_ref: (n_rep, 32, 32)]               only if n_rep > 0 (masks pre-folded)
      [b_hid_ref: (n_rep, 1, 32)]                only if n_rep > 0 and has_bias
      w_out_ref : (32, 24)                       (mask pre-folded)
      [b_out_ref: (1, 24)]                       only if has_bias
      o_ref     : (tb, 24)                       output block
    """
    refs = list(refs)
    o_ref = refs.pop()
    it = iter(refs)
    x_ref = next(it)
    w_in_ref = next(it)
    b_in_ref = next(it) if has_bias else None
    w_hid_ref = b_hid_ref = None
    if n_rep > 0:
        w_hid_ref = next(it)
        if has_bias:
            b_hid_ref = next(it)
    w_out_ref = next(it)
    b_out_ref = next(it) if has_bias else None

    op_dt = x_ref.dtype
    f32 = jnp.float32

    h = jnp.dot(x_ref[...], w_in_ref[...], preferred_element_type=f32)
    if has_bias:
        h = h + b_in_ref[...]
    h = jnp.maximum(h, 0.0)
    # TODO(synk): F.dropout is training-mode only; the eval-mode forward is identity.
    for i in range(n_rep):
        hi = h.astype(op_dt) if op_dt != f32 else h
        h = jnp.dot(hi, w_hid_ref[i], preferred_element_type=f32)
        if has_bias:
            h = h + b_hid_ref[i]
        h = jnp.maximum(h, 0.0)
    hf = h.astype(op_dt) if op_dt != f32 else h
    y = jnp.dot(hf, w_out_ref[...], preferred_element_type=f32)
    if has_bias:
        y = y + b_out_ref[...]
    o_ref[...] = y.astype(o_ref.dtype)


# ----------------------------------- wrapper -----------------------------------

def bd_32x24_forward(x, input_weight, hidden_weights, output_weights,
                     input_bias=None, hidden_biases=None, output_bias=None,
                     block_b=4096):
    """Forward pass of BD_32x24 (eval mode).  Returns (B, 24) in x.dtype.

    block_b: max batch rows per grid step.  At the default 4096 (f32) the per-step
    VMEM footprint (double-buffered x/out blocks + (tb, 32) activation temps) is
    ~15 MiB, safely under the explicit 48 MiB scoped-VMEM limit set below and under
    v7x's 64 MiB physical VMEM.
    """
    B, n_in = x.shape
    n_rep = len(hidden_weights)
    has_bias = input_bias is not None
    op_dt = x.dtype
    itemsize = x.dtype.itemsize

    hid_mask = _block_diag_mask(8, 8, 4)        # (32, 32)
    out_mask = _block_diag_mask(4, 3, 8)        # (32, 24)

    # Fold masks into weights in the wrapper (tiny constants; zero per-step work).
    w_in = jnp.asarray(input_weight, jnp.float32).astype(op_dt)              # (n_in, 32)
    w_out = (out_mask * jnp.asarray(output_weights, jnp.float32)).astype(op_dt)  # (32, 24)
    w_hid = None
    if n_rep > 0:
        w_hid = jnp.stack([hid_mask * jnp.asarray(w, jnp.float32)
                           for w in hidden_weights], axis=0).astype(op_dt)   # (n_rep, 32, 32)

    # Biases stay f32 (elementwise work is done in f32 inside the kernel).
    b_in = b_out = b_hid = None
    if has_bias:
        b_in = jnp.asarray(input_bias, jnp.float32).reshape(1, N_HIDDEN)
        b_out = jnp.asarray(output_bias, jnp.float32).reshape(1, N_OUTPUT)
        if n_rep > 0:
            b_hid = jnp.stack([jnp.asarray(b, jnp.float32).reshape(1, N_HIDDEN)
                               for b in hidden_biases], axis=0)              # (n_rep, 1, 32)

    # ---- batch tiling: batch-major, sublane (8-row) granularity, minimal padding ----
    b8 = _round_up(B, SUBLANE)
    max_tb = max(SUBLANE, _round_up(block_b, SUBLANE))
    n_blocks = _cdiv(b8, max_tb)
    if b8 >= 256:
        n_blocks = max(n_blocks, 2)          # let "parallel" split across v7x's 2 TCs
    if n_blocks > 1 and n_blocks % 2:
        n_blocks += 1                        # even block count for the 2-core split
    tb = _round_up(_cdiv(b8, n_blocks), SUBLANE)
    b_pad = _round_up(b8, tb)
    n_grid = b_pad // tb

    x_in = x if b_pad == B else jnp.pad(x, ((0, b_pad - B), (0, 0)))

    # ---- assemble args / specs (params use constant index_maps -> VMEM-resident) ----
    args = [x_in]
    in_specs = [pl.BlockSpec((tb, n_in), lambda i: (i, 0))]

    def _add_const(a):
        args.append(a)
        in_specs.append(pl.BlockSpec(a.shape, lambda i, _nd=a.ndim: (0,) * _nd))

    _add_const(w_in)
    if has_bias:
        _add_const(b_in)
    if n_rep > 0:
        _add_const(w_hid)
        if has_bias:
            _add_const(b_hid)
    _add_const(w_out)
    if has_bias:
        _add_const(b_out)

    flops = 2 * b_pad * (n_in * N_HIDDEN + n_rep * N_HIDDEN * N_HIDDEN
                         + N_HIDDEN * N_OUTPUT)
    param_bytes = sum(int(a.size) * a.dtype.itemsize for a in args[1:])
    bytes_accessed = b_pad * (n_in + N_OUTPUT) * itemsize + param_bytes

    out = pl.pallas_call(
        functools.partial(_bd_kernel, n_rep, has_bias),
        out_shape=jax.ShapeDtypeStruct((b_pad, N_OUTPUT), op_dt),
        grid=(n_grid,),
        in_specs=in_specs,
        out_specs=pl.BlockSpec((tb, N_OUTPUT), lambda i: (i, 0)),
        compiler_params=pltpu.CompilerParams(
            dimension_semantics=("parallel",),
            vmem_limit_bytes=48 * 1024 * 1024),
        cost_estimate=pl.CostEstimate(flops=flops, transcendentals=0,
                                      bytes_accessed=bytes_accessed),
    )(*args)

    return out if b_pad == B else out[:B]


# ------------------------------ pure-JAX reference ------------------------------

def reference_forward(x, input_weight, hidden_weights, output_weights,
                      input_bias=None, hidden_biases=None, output_bias=None):
    hid_mask = _block_diag_mask(8, 8, 4)
    out_mask = _block_diag_mask(4, 3, 8)
    hp = jax.lax.Precision.HIGHEST
    h = jnp.dot(x.astype(jnp.float32), jnp.asarray(input_weight, jnp.float32),
                precision=hp)
    if input_bias is not None:
        h = h + input_bias
    h = jax.nn.relu(h)
    for i, w in enumerate(hidden_weights):
        h = jnp.dot(h, hid_mask * jnp.asarray(w, jnp.float32), precision=hp)
        if hidden_biases is not None:
            h = h + hidden_biases[i]
        h = jax.nn.relu(h)
    out = jnp.dot(h, out_mask * jnp.asarray(output_weights, jnp.float32), precision=hp)
    if output_bias is not None:
        out = out + output_bias
    return out


if __name__ == "__main__":
    key = jax.random.PRNGKey(0)
    k_x, k_in, k_h1, k_h2, k_out = jax.random.split(key, 5)

    B = 16
    N_INPUT = 64
    N_HIDDEN_LAYERS = 3          # input layer + 2 block-diagonal hidden layers + output
    # bias=False (module default)

    # torch.rand-style U[0,1) parameter init, matching the module
    input_weight = jax.random.uniform(k_in, (N_INPUT, N_HIDDEN), jnp.float32)
    hidden_weights = [jax.random.uniform(k, (N_HIDDEN, N_HIDDEN), jnp.float32)
                      for k in (k_h1, k_h2)]
    assert len(hidden_weights) == N_HIDDEN_LAYERS - 1
    output_weights = jax.random.uniform(k_out, (N_HIDDEN, N_OUTPUT), jnp.float32)

    x = jax.random.uniform(k_x, (B, N_INPUT), jnp.float32)

    y = bd_32x24_forward(x, input_weight, hidden_weights, output_weights)
    y = jax.block_until_ready(y)

    y_ref = reference_forward(x, input_weight, hidden_weights, output_weights)
    assert y.shape == (B, N_OUTPUT), y.shape
    assert jnp.allclose(y, y_ref, rtol=2e-4, atol=1e-2), \
        f"mismatch vs reference, max abs err = {float(jnp.max(jnp.abs(y - y_ref)))}"

    print("KERNEL_OK")
</pallas_src>

<mosaic_0001>
module attributes {stable_mosaic.version = 11 : i64} {
  func.func @_bd_kernel(%arg0: i32, %arg1: memref<16x64xf32, #tpu.memory_space<vmem>>, %arg2: memref<64x32xf32, #tpu.memory_space<vmem>>, %arg3: memref<2x32x32xf32, #tpu.memory_space<vmem>>, %arg4: memref<32x24xf32, #tpu.memory_space<vmem>>, %arg5: memref<16x24xf32, #tpu.memory_space<vmem>>) attributes {dimension_semantics = [#tpu.dimension_semantics<parallel>], iteration_bounds = array<i64: 1>, scalar_prefetch = 0 : i64, scratch_operands = 0 : i64, tpu.core_type = #tpu.core_type<tc>, window_params = [{transform_indices = @transform_0, window_bounds = array<i64: 16, 64>}, {pipeline_mode = #tpu.pipeline_mode<synchronous>, transform_indices = @transform_1, window_bounds = array<i64: 64, 32>}, {pipeline_mode = #tpu.pipeline_mode<synchronous>, transform_indices = @transform_2, window_bounds = array<i64: 2, 32, 32>}, {pipeline_mode = #tpu.pipeline_mode<synchronous>, transform_indices = @transform_3, window_bounds = array<i64: 32, 24>}, {transform_indices = @transform_4, window_bounds = array<i64: 16, 24>}]} {
    %c0 = arith.constant 0 : index
    %c0_0 = arith.constant 0 : index
    %0 = vector.load %arg1[%c0, %c0_0] : memref<16x64xf32, #tpu.memory_space<vmem>>, vector<16x64xf32>
    %c0_1 = arith.constant 0 : index
    %c0_2 = arith.constant 0 : index
    %1 = vector.load %arg2[%c0_1, %c0_2] : memref<64x32xf32, #tpu.memory_space<vmem>>, vector<64x32xf32>
    %cst = arith.constant dense<0.000000e+00> : vector<16x32xf32>
    %2 = tpu.matmul %0, %1, %cst {dimension_numbers = #tpu.dot_dimension_numbers<[1], [0], [0], [1], [0, 0, 1, 1], [], []>} : vector<16x64xf32>, vector<64x32xf32>, vector<16x32xf32> -> vector<16x32xf32>
    %cst_3 = arith.constant 0.000000e+00 : f32
    %3 = vector.broadcast %cst_3 : f32 to vector<16x32xf32>
    %4 = arith.maximumf %2, %3 : vector<16x32xf32>
    %c0_4 = arith.constant 0 : index
    %c0_5 = arith.constant 0 : index
    %c0_6 = arith.constant 0 : index
    %5 = vector.load %arg3[%c0_4, %c0_5, %c0_6] : memref<2x32x32xf32, #tpu.memory_space<vmem>>, vector<1x32x32xf32>
    %6 = vector.shape_cast %5 : vector<1x32x32xf32> to vector<32x32xf32>
    %cst_7 = arith.constant dense<0.000000e+00> : vector<16x32xf32>
    %7 = tpu.matmul %4, %6, %cst_7 {dimension_numbers = #tpu.dot_dimension_numbers<[1], [0], [0], [1], [0, 0, 1, 1], [], []>} : vector<16x32xf32>, vector<32x32xf32>, vector<16x32xf32> -> vector<16x32xf32>
    %cst_8 = arith.constant 0.000000e+00 : f32
    %8 = vector.broadcast %cst_8 : f32 to vector<16x32xf32>
    %9 = arith.maximumf %7, %8 : vector<16x32xf32>
    %c1 = arith.constant 1 : index
    %c0_9 = arith.constant 0 : index
    %c0_10 = arith.constant 0 : index
    %10 = vector.load %arg3[%c1, %c0_9, %c0_10] : memref<2x32x32xf32, #tpu.memory_space<vmem>>, vector<1x32x32xf32>
    %11 = vector.shape_cast %10 : vector<1x32x32xf32> to vector<32x32xf32>
    %cst_11 = arith.constant dense<0.000000e+00> : vector<16x32xf32>
    %12 = tpu.matmul %9, %11, %cst_11 {dimension_numbers = #tpu.dot_dimension_numbers<[1], [0], [0], [1], [0, 0, 1, 1], [], []>} : vector<16x32xf32>, vector<32x32xf32>, vector<16x32xf32> -> vector<16x32xf32>
    %cst_12 = arith.constant 0.000000e+00 : f32
    %13 = vector.broadcast %cst_12 : f32 to vector<16x32xf32>
    %14 = arith.maximumf %12, %13 : vector<16x32xf32>
    %c0_13 = arith.constant 0 : index
    %c0_14 = arith.constant 0 : index
    %15 = vector.load %arg4[%c0_13, %c0_14] : memref<32x24xf32, #tpu.memory_space<vmem>>, vector<32x24xf32>
    %cst_15 = arith.constant dense<0.000000e+00> : vector<16x24xf32>
    %16 = tpu.matmul %14, %15, %cst_15 {dimension_numbers = #tpu.dot_dimension_numbers<[1], [0], [0], [1], [0, 0, 1, 1], [], []>} : vector<16x32xf32>, vector<32x24xf32>, vector<16x24xf32> -> vector<16x24xf32>
    %c0_16 = arith.constant 0 : index
    %c0_17 = arith.constant 0 : index
    %17 = vector.load %arg5[%c0_16, %c0_17] : memref<16x24xf32, #tpu.memory_space<vmem>>, vector<16x24xf32>
    tpu.vector_store %arg5[%c0_16, %c0_17], %16 {strides = array<i32>} : memref<16x24xf32, #tpu.memory_space<vmem>>, vector<16x24xf32>,
    return
  }
  func.func @transform_0(%arg0: i32) -> (i32, i32) {
    %c0_i32 = arith.constant 0 : i32
    %c0_i32_0 = arith.constant 0 : i32
    return %arg0, %c0_i32 : i32, i32
  }
  func.func @transform_1(%arg0: i32) -> (i32, i32) {
    %c0_i32 = arith.constant 0 : i32
    %c0_i32_0 = arith.constant 0 : i32
    %c0_i32_1 = arith.constant 0 : i32
    return %c0_i32, %c0_i32_0 : i32, i32
  }
  func.func @transform_2(%arg0: i32) -> (i32, i32, i32) {
    %c0_i32 = arith.constant 0 : i32
    %c0_i32_0 = arith.constant 0 : i32
    %c0_i32_1 = arith.constant 0 : i32
    %c0_i32_2 = arith.constant 0 : i32
    return %c0_i32, %c0_i32_0, %c0_i32_1 : i32, i32, i32
  }
  func.func @transform_3(%arg0: i32) -> (i32, i32) {
    %c0_i32 = arith.constant 0 : i32
    %c0_i32_0 = arith.constant 0 : i32
    %c0_i32_1 = arith.constant 0 : i32
    return %c0_i32, %c0_i32_0 : i32, i32
  }
  func.func @transform_4(%arg0: i32) -> (i32, i32) {
    %c0_i32 = arith.constant 0 : i32
    %c0_i32_0 = arith.constant 0 : i32
    return %arg0, %c0_i32 : i32, i32
  }
}

</mosaic_0001>

<bundles_post_ra>
// kernel: tpu_custom_call.1
= control target key start
LH: loop header
LB: loop body
LE: loop exit
PB: predicated region body
PF: predicated region fallthrough
CT: control target
= control target key end

     0   :  { %s330_s0 = inlined_call_operand.vmem [shape: f32[16,64], index: 0, kind: input, shape index: {}]   ;;  %s331_s1 = inlined_call_operand.vmem [shape: f32[64,32], index: 1, kind: input, shape index: {}]   ;;  %s332_s2 = inlined_call_operand.vmem [shape: f32[2,32,32], index: 2, kind: input, shape index: {}]   ;;  %s333_s3 = inlined_call_operand.vmem [shape: f32[32,24], index: 3, kind: input, shape index: {}]   ;;  %s334_s4 = inlined_call_operand.hbm [shape: f32[16,24], index: 4, kind: output, shape index: {}]  }
   0x1   :  { %v27_v0 = vld [vmem:[%s331_s1 + $0x38] sm:$0xff]  ;;  %v26_v1 = vld [vmem:[%s331_s1 + $0x30] sm:$0xff]  ;;  %v25_v2 = vld [vmem:[%s331_s1 + $0x28] sm:$0xff] }
   0x2   :  { %43 = vmatpush.msra.mxu0 %v27_v0  ;;  %v63_v3 = vld [vmem:[%s332_s2 + $0x18] sm:$0xff]  ;;  %v62_v4 = vld [vmem:[%s332_s2 + $0x10] sm:$0xff]  ;;  %v24_v5 = vld [vmem:[%s331_s1 + $0x20] sm:$0xff] }
   0x3   :  { %83 = vmatpush.msra.mxu1 %v63_v3 }
   0x4   :  { %44 = vmatpush.msra.mxu0 %v26_v1 }
   0x5   :  { %9 = vsyncpa [#allocation3], 0  ;;  %v23_v6 = vld [vmem:[%s331_s1 + $0x18] sm:$0xff]  ;;  %84 = vmatpush.msra.mxu1 %v62_v4  ;;  %v22_v7 = vld [vmem:[%s331_s1 + $0x10] sm:$0xff]  ;;  %vm28_vm0 = vcmask 523264   ;;  %vm64_vm1 = vcmask 261120  }
   0x6   :  { %45 = vmatpush.msra.mxu0 %v25_v2  ;;  %v21_v8 = vld [vmem:[%s331_s1 + $0x8] sm:$0xff]  ;;  %v20_v9 = vld [vmem:[%s331_s1] sm:$0xff]  ;;  %v193_v14 = vld [vmem:[%s332_s2 + $0x38] sm:$0xff]  ;;  %vm165_vm2 = vcmask 195584   ;;  %s227_s30 = smov [#allocation2]   ;;  %s174_s8 = sshll.u32 %s334_s4, 4  ;;  %s175_s8 = int_to_ptr.hbm [resolvable:$true] %s174_s8 }
   0x7   :  { %v18_v10 = vld [vmem:[%s330_s0] sm:$0xff]  ;;  %v19_v11 = vld [vmem:[%s330_s0 + $0x8] sm:$0xff]  ;;  %v192_v15 = vld [vmem:[%s332_s2 + $0x30] sm:$0xff]  ;;  %119 = vmatpush.msra.mxu2 %v193_v14  ;;  %s172_s5 = sshll.u32 %s227_s30, 4  ;;  %s229_s9 = smov 8   ;;  %s173_s5 = int_to_ptr.vmem [resolvable:$true] %s172_s5 }
   0x8   :  { %46 = vmatpush.msra.mxu0 %v24_v5  ;;  %v61_v12 = vld [vmem:[%s332_s2 + $0x8] sm:$0xff]  ;;  %v60_v13 = vld [vmem:[%s332_s2] sm:$0xff]  ;;  %v135_v22 = vld [vmem:[%s333_s3 + $0x18] sm:$0xff] }
   0x9   :  { %85 = vmatpush.msra.mxu1 %v61_v12  ;;  %120 = vmatpush.msra.mxu2 %v192_v15  ;;  %v191_v20 = vld [vmem:[%s332_s2 + $0x28] sm:$0xff]  ;;  %v190_v21 = vld [vmem:[%s332_s2 + $0x20] sm:$0xff]  ;;  %v134_v23 = vld [vmem:[%s333_s3 + $0x10] sm:$0xff] }
   0xa   :  { %47 = vmatpush.msra.mxu0 %v23_v6  ;;  %154 = vmatpush.msra.mxu3 %v135_v22  ;;  %v133_v28 = vld [vmem:[%s333_s3 + $0x8] sm:$0xff]  ;;  %v132_v29 = vld [vmem:[%s333_s3] sm:$0xff]  ;;  %s228_s3 = smov 128  }
   0xb   :  { %86 = vmatpush.msra.mxu1 %v60_v13  ;;  %121 = vmatpush.msra.mxu2 %v191_v20 }
   0xc   :  { %48 = vmatpush.msra.mxu0 %v22_v7  ;;  %155 = vmatpush.msra.mxu3 %v134_v23 }
   0xd   :  { %122 = vmatpush.msra.mxu2 %v190_v21 }
   0xe   :  { %49 = vmatpush.msra.mxu0 %v21_v8  ;;  %156 = vmatpush.msra.mxu3 %v133_v28 }
  0x10   :  { %50 = vmatpush.msra.mxu0 %v20_v9  ;;  %157 = vmatpush.msra.mxu3 %v132_v29 }
  0x11   :  { %186 = vmatmul.msk.f32.vlgmr.msra.gmra.mxu0 %vm28_vm0, %v18_v10 }
  0x19   :  { %187 = vmatmul.msk.f32.gmra.mxu0 %vm28_vm0, %v19_v11 }
  0x8e   :  { %v52_v16 = vpop.f32.mrf.mxu0 }
  0x8f   :  { %v58_v17 = vmax.f32 %v52_v16, 0.0 }
  0x91   :  { %188 = vmatmul.msk.f32.vlgmr.msra.gmra.mxu1 %vm64_vm1, %v58_v17 }
  0x96   :  { %v55_v18 = vpop.f32.mrf.mxu0 }
  0x97   :  { %v59_v19 = vmax.f32 %v55_v18, 0.0 }
  0x99   :  { %189 = vmatmul.msk.f32.gmra.mxu1 %vm64_vm1, %v59_v19 }
 0x10e   :  { %v88_v24 = vpop.f32.mrf.mxu1 }
 0x10f   :  { %v94_v25 = vmax.f32 %v88_v24, 0.0 }
 0x111   :  { %194 = vmatmul.msk.f32.vlgmr.msra.gmra.mxu2 %vm64_vm1, %v94_v25 }
 0x116   :  { %v91_v26 = vpop.f32.mrf.mxu1 }
 0x117   :  { %v95_v27 = vmax.f32 %v91_v26, 0.0 }
 0x119   :  { %195 = vmatmul.msk.f32.gmra.mxu2 %vm64_vm1, %v95_v27 }
 0x194   :  { %v124_v30 = vpop.f32.mrf.mxu2 }
 0x195   :  { %v130_v31 = vmax.f32 %v124_v30, 0.0 }
 0x197   :  { %196 = vmatmul.msk.f32.vlgmr.msra.gmra.mxu3 %vm64_vm1, %v130_v31 }
 0x19c   :  { %v127_v32 = vpop.f32.mrf.mxu2 }
 0x19d   :  { %v131_v33 = vmax.f32 %v127_v32, 0.0 }
 0x19f   :  { %197 = vmatmul.msk.f32.gmra.mxu3 %vm64_vm1, %v131_v33 }
 0x21a   :  { %v159_v34 = vpop.f32.mrf.mxu3 }
 0x21b   :  { %166 = vst.msk [vmem:[#allocation2] sm:$0xff] %vm165_vm2, %v159_v34 }
 0x222   :  { %v162_v35 = vpop.f32.mrf.mxu3 }
 0x223   :  { %167 = vst.msk [vmem:[#allocation2 + $0x8] sm:$0xff] %vm165_vm2, %v162_v35 }
 0x224   :  { %180 = dma.vmem_to_hbm [thread:$0]  %s173_s5, 256, %s175_s8, [#allocation3], %s228_s3, %s228_s3, %s229_s9  }
 0x225   :  { %225 = dma.done.wait [#allocation3], 256  }
 0x226   :  { %226 = vsyncadd [#allocation3], 4294967040 }
 0x227   :  { %185 = vsyncpa [#allocation3], 1 }

</bundles_post_ra>
